<compile_context>
chip_gen: v7x
topology: tpu7x:2x2x1
jax: 0.10.0
libtpu: 0.0.40
codegen_flags: <defaults>
</compile_context>

<pallas_src>
import jax
import jax.numpy as jnp
from jax.experimental import pallas as pl
from jax.experimental.pallas import tpu as pltpu


def _make_cls_head_kernel(tb, chans, lanes, n_chunks):
    """Build the kernel closure for a fixed (row-tile, channel, lane) config."""
    trows = tb * chans

    def kernel(x_ref, w_ref, b_ref, o_ref, acc_ref):
        # x_ref:   (TROWS, THW)  streaming block of [B*C, H*W]
        # w_ref:   (C, D)        fc_weight^T, pre-scaled by 1/(H*W)
        # b_ref:   (1, D)        fc bias
        # o_ref:   (TB, D)       softmax probabilities (written at last HW step)
        # acc_ref: (TROWS, lanes) f32 lane-wide running spatial sum
        j = pl.program_id(1)

        @pl.when(j == 0)
        def _init():
            acc_ref[...] = jnp.zeros_like(acc_ref)

        # ---- streaming phase: lane-aligned VPU adds only (no XLU work) ----
        acc = acc_ref[...]
        for k in range(n_chunks):  # static unroll, lane-aligned slices
            acc = acc + x_ref[:, k * lanes:(k + 1) * lanes].astype(jnp.float32)
        acc_ref[...] = acc

        @pl.when(j == pl.num_programs(1) - 1)
        def _finalize():
            # Single cross-lane reduce per row tile (amortized over H*W stream).
            pooled_col = jnp.sum(acc_ref[...], axis=-1, keepdims=True)  # (TROWS,1)
            w = w_ref[...].astype(jnp.float32)                          # (C, D)
            # Replicate weight per batch row in VMEM (finalize-only, tiny).
            wrep = jnp.concatenate([w] * tb, axis=0) if tb > 1 else w   # (TROWS,D)
            contrib = pooled_col * wrep                                 # (TROWS,D)
            # Batch-selection matrix from iotas (no HBM load, no integer div):
            # sel[b, r] = 1 iff b*C <= r < (b+1)*C.
            ri = jax.lax.broadcasted_iota(jnp.int32, (tb, trows), 1)
            lo = jax.lax.broadcasted_iota(jnp.int32, (tb, trows), 0) * chans
            sel = ((ri >= lo) & (ri < lo + chans)).astype(jnp.float32)  # (TB,TROWS)
            logits = jnp.dot(sel, contrib, preferred_element_type=jnp.float32)
            logits = logits + b_ref[...].astype(jnp.float32)
            m = jnp.max(logits, axis=-1, keepdims=True)
            e = jnp.exp(logits - m)
            probs = e / jnp.sum(e, axis=-1, keepdims=True)
            o_ref[...] = probs.astype(o_ref.dtype)

    return kernel


def _pick_tiles(batch, chans, hw, itemsize, hw_tile=None, budget_bytes=16 << 20):
    """Choose (row_tile TB, hw_tile THW) respecting block-shape legality and a
    VMEM budget that covers the streamed double buffer, the f32 accumulator
    and the finalize temporaries. Conservative enough for v5e/v6e/v7x."""
    rows = batch * chans
    sub_mult = 16 if itemsize == 2 else 8   # bf16 needs 16-row sublane packing

    if hw_tile is not None:
        hw_cands = [hw_tile]
    elif hw % 128 == 0:
        hw_cands = []
        for t in (hw, 2048, 1024, 512, 256, 128):  # prefer full-HW (contiguous DMA)
            if t <= hw and hw % t == 0 and t not in hw_cands:
                hw_cands.append(t)
    else:
        hw_cands = [hw]  # full-extent block along H*W is always legal

    divs = [d for d in range(batch, 0, -1) if batch % d == 0]
    # v7x has 2 TensorCores: when B is big enough keep >= 2 row tiles on the
    # "parallel" grid axis so both cores get work.  No effect on v5e/v6e.
    tb_cands = [d for d in divs if batch < 16 or d <= batch // 2] or divs

    def legal(tb):
        trows = tb * chans
        row_ok = (trows == rows) or (trows % sub_mult == 0)
        out_ok = (tb == batch) or (tb % sub_mult == 0)
        return row_ok and out_ok

    def vmem_cost(tb, thw):
        trows = tb * chans
        lanes = 128 if thw % 128 == 0 else thw
        return (2 * trows * thw * itemsize   # double-buffered x stream
                + trows * lanes * 4          # f32 accumulator scratch
                + tb * trows * 4             # in-kernel selection matrix
                + trows * 128 * 4)           # replicated weight (lane-padded)

    for thw in hw_cands:
        for tb in tb_cands:
            if legal(tb) and vmem_cost(tb, thw) <= budget_bytes:
                return tb, thw

    # Last resort: smallest legal row tile with the smallest hw tile.
    # TODO(synk): add a channel-tile grid axis for very large C that still
    # exceeds the VMEM budget even at the smallest legal row tile.
    thw = hw_cands[-1]
    for tb in sorted(divs):
        if legal(tb):
            return tb, thw
    return batch, thw  # full-extent blocks are always legal


def cls_head_forward(x_nchw, fc_weight, fc_bias, *, hw_tile=None):
    """x_nchw: (B, C, H, W); fc_weight: (class_dim, C); fc_bias: (class_dim,)."""
    B, C, H, W = x_nchw.shape
    D = fc_weight.shape[0]
    HW = H * W
    ROWS = B * C
    itemsize = jnp.dtype(x_nchw.dtype).itemsize

    # Layout: [B*C, H*W] -> H*W lane-dense, B*C on sublanes (contiguous rows).
    x2d = x_nchw.reshape(ROWS, HW)

    TB, THW = _pick_tiles(B, C, HW, itemsize, hw_tile=hw_tile)
    assert HW % THW == 0 and B % TB == 0
    TROWS = TB * C
    LANES = 128 if THW % 128 == 0 else THW
    n_chunks = THW // LANES

    # 1/(H*W) mean-pool scaling folded into the (un-replicated) weight so the
    # streaming loop is pure adds.
    w_scaled = fc_weight.T.astype(jnp.float32) * (1.0 / HW)   # (C, D)
    bias2d = fc_bias.reshape(1, D).astype(jnp.float32)        # (1, D)

    grid = (B // TB, HW // THW)

    est_vmem = (2 * TROWS * THW * itemsize + TROWS * LANES * 4
                + 2 * (C * D + D) * 4 + 2 * TB * D * itemsize
                + TB * TROWS * 4 + TROWS * 128 * 4)
    vmem_limit = int(min(max(32 << 20, est_vmem + (16 << 20)), 64 << 20))

    cost = pl.CostEstimate(
        flops=int(2 * ROWS * HW + 2 * B * TROWS * D + 8 * B * D),
        transcendentals=int(B * D),
        bytes_accessed=int(ROWS * HW * itemsize + (C * D + D) * 4
                           + B * D * itemsize))

    kernel = _make_cls_head_kernel(TB, C, LANES, n_chunks)

    out = pl.pallas_call(
        kernel,
        out_shape=jax.ShapeDtypeStruct((B, D), x_nchw.dtype),
        grid_spec=pltpu.PrefetchScalarGridSpec(
            num_scalar_prefetch=0,
            grid=grid,
            in_specs=[
                pl.BlockSpec((TROWS, THW), lambda i, j: (i, j)),  # streamed x
                pl.BlockSpec((C, D), lambda i, j: (0, 0)),        # scaled weight
                pl.BlockSpec((1, D), lambda i, j: (0, 0)),        # bias
            ],
            out_specs=pl.BlockSpec((TB, D), lambda i, j: (i, 0)),
            scratch_shapes=[pltpu.VMEM((TROWS, LANES), jnp.float32)],
        ),
        compiler_params=pltpu.CompilerParams(
            dimension_semantics=("parallel", "arbitrary"),
            vmem_limit_bytes=vmem_limit,
        ),
        cost_estimate=cost,
    )(x2d, w_scaled, bias2d)
    return out


if __name__ == "__main__":
    key = jax.random.PRNGKey(0)
    k_x, k_w, k_b = jax.random.split(key, 3)

    # Small shapes consistent with the module: batch=2, in_channels=4,
    # spatial 16x16, class_dim=4 (text-orientation classes).
    B, C, H, W = 2, 4, 16, 16
    class_dim = 4

    x = jax.random.normal(k_x, (B, C, H, W), dtype=jnp.float32)
    fc_weight = jax.random.normal(k_w, (class_dim, C), dtype=jnp.float32) * 0.1
    fc_bias = jax.random.normal(k_b, (class_dim,), dtype=jnp.float32) * 0.1

    # Reference in plain JAX (same math as the PyTorch module).
    pooled_ref = jnp.mean(x, axis=(2, 3))
    logits_ref = pooled_ref @ fc_weight.T + fc_bias
    ref = jax.nn.softmax(logits_ref, axis=1)

    # hw_tile=128 forces a 2-step streaming reduction over H*W=256 so the
    # accumulate/finalize pipeline path is exercised even at this toy size.
    out = jax.block_until_ready(cls_head_forward(x, fc_weight, fc_bias, hw_tile=128))
    assert out.shape == (B, class_dim)
    assert jnp.allclose(out, ref, atol=1e-3, rtol=1e-3), float(jnp.max(jnp.abs(out - ref)))
    assert jnp.allclose(jnp.sum(out, axis=1), 1.0, atol=1e-3)

    # Auto-tiled path (full-HW block, single reduction step).
    out2 = jax.block_until_ready(cls_head_forward(x, fc_weight, fc_bias))
    assert jnp.allclose(out2, ref, atol=1e-3, rtol=1e-3), float(jnp.max(jnp.abs(out2 - ref)))

    print("KERNEL_OK")
</pallas_src>

<mosaic_0001>
module attributes {stable_mosaic.version = 11 : i64} {
  func.func @kernel(%arg0: i32, %arg1: i32, %arg2: memref<8x128xf32, #tpu.memory_space<vmem>>, %arg3: memref<4x4xf32, #tpu.memory_space<vmem>>, %arg4: memref<1x4xf32, #tpu.memory_space<vmem>>, %arg5: memref<2x4xf32, #tpu.memory_space<vmem>>, %arg6: memref<8x128xf32, #tpu.memory_space<vmem>>) attributes {dimension_semantics = [#tpu.dimension_semantics<parallel>, #tpu.dimension_semantics<arbitrary>], iteration_bounds = array<i64: 1, 2>, scalar_prefetch = 0 : i64, scratch_operands = 1 : i64, tpu.core_type = #tpu.core_type<tc>, window_params = [{transform_indices = @transform_0, window_bounds = array<i64: 8, 128>}, {pipeline_mode = #tpu.pipeline_mode<synchronous>, transform_indices = @transform_1, window_bounds = array<i64: 4, 4>}, {pipeline_mode = #tpu.pipeline_mode<synchronous>, transform_indices = @transform_2, window_bounds = array<i64: 1, 4>}, {transform_indices = @transform_3, window_bounds = array<i64: 2, 4>}]} {
    %c0_i32 = arith.constant 0 : i32
    %0 = arith.cmpi eq, %arg1, %c0_i32 : i32
    %1 = arith.extui %0 : i1 to i32
    %c0_i32_0 = arith.constant 0 : i32
    %2 = arith.cmpi ne, %1, %c0_i32_0 : i32
    scf.if %2 {
      %cst = arith.constant 0.000000e+00 : f32
      %10 = vector.broadcast %cst : f32 to vector<8x128xf32>
      %c0_7 = arith.constant 0 : index
      %c0_8 = arith.constant 0 : index
      %11 = vector.load %arg6[%c0_7, %c0_8] : memref<8x128xf32, #tpu.memory_space<vmem>>, vector<8x128xf32>
      tpu.vector_store %arg6[%c0_7, %c0_8], %10 {strides = array<i32>} : memref<8x128xf32, #tpu.memory_space<vmem>>, vector<8x128xf32>,
    } else {
    }
    %c0 = arith.constant 0 : index
    %c0_1 = arith.constant 0 : index
    %3 = vector.load %arg6[%c0, %c0_1] : memref<8x128xf32, #tpu.memory_space<vmem>>, vector<8x128xf32>
    %c0_2 = arith.constant 0 : index
    %c0_3 = arith.constant 0 : index
    %4 = vector.load %arg2[%c0_2, %c0_3] : memref<8x128xf32, #tpu.memory_space<vmem>>, vector<8x128xf32>
    %5 = arith.addf %3, %4 : vector<8x128xf32>
    %c0_4 = arith.constant 0 : index
    %c0_5 = arith.constant 0 : index
    %6 = vector.load %arg6[%c0_4, %c0_5] : memref<8x128xf32, #tpu.memory_space<vmem>>, vector<8x128xf32>
    tpu.vector_store %arg6[%c0_4, %c0_5], %5 {strides = array<i32>} : memref<8x128xf32, #tpu.memory_space<vmem>>, vector<8x128xf32>,
    %c1_i32 = arith.constant 1 : i32
    %7 = arith.cmpi eq, %arg1, %c1_i32 : i32
    %8 = arith.extui %7 : i1 to i32
    %c0_i32_6 = arith.constant 0 : i32
    %9 = arith.cmpi ne, %8, %c0_i32_6 : i32
    scf.if %9 {
      %c0_7 = arith.constant 0 : index
      %c0_8 = arith.constant 0 : index
      %10 = vector.load %arg6[%c0_7, %c0_8] : memref<8x128xf32, #tpu.memory_space<vmem>>, vector<8x128xf32>
      %cst = arith.constant dense<0.000000e+00> : vector<8xf32>
      %11 = vector.multi_reduction <add>, %10, %cst [1] : vector<8x128xf32> to vector<8xf32>
      %12 = vector.shape_cast %11 : vector<8xf32> to vector<8x1xf32>
      %c0_9 = arith.constant 0 : index
      %c0_10 = arith.constant 0 : index
      %13 = vector.load %arg3[%c0_9, %c0_10] : memref<4x4xf32, #tpu.memory_space<vmem>>, vector<4x4xf32>
      %14 = tpu.concatenate %13, %13 in 0 : vector<4x4xf32>, vector<4x4xf32> -> vector<8x4xf32>
      %15 = vector.broadcast %12 : vector<8x1xf32> to vector<8x4xf32>
      %16 = arith.mulf %15, %14 : vector<8x4xf32>
      %17 = tpu.iota {dimensions = array<i32: 1>} : vector<2x8xi32>
      %18 = tpu.iota {dimensions = array<i32: 0>} : vector<2x8xi32>
      %c4_i32 = arith.constant 4 : i32
      %19 = vector.broadcast %c4_i32 : i32 to vector<2x8xi32>
      %20 = arith.muli %18, %19 : vector<2x8xi32>
      %21 = arith.cmpi sge, %17, %20 : vector<2x8xi32>
      %c4_i32_11 = arith.constant 4 : i32
      %22 = vector.broadcast %c4_i32_11 : i32 to vector<2x8xi32>
      %23 = arith.addi %20, %22 : vector<2x8xi32>
      %24 = arith.cmpi slt, %17, %23 : vector<2x8xi32>
      %25 = arith.andi %21, %24 : vector<2x8xi1>
      %26 = arith.extui %25 : vector<2x8xi1> to vector<2x8xi32>
      %27 = arith.sitofp %26 : vector<2x8xi32> to vector<2x8xf32>
      %cst_12 = arith.constant dense<0.000000e+00> : vector<2x4xf32>
      %28 = tpu.matmul %27, %16, %cst_12 {dimension_numbers = #tpu.dot_dimension_numbers<[1], [0], [0], [1], [0, 0, 1, 1], [], []>} : vector<2x8xf32>, vector<8x4xf32>, vector<2x4xf32> -> vector<2x4xf32>
      %c0_13 = arith.constant 0 : index
      %c0_14 = arith.constant 0 : index
      %29 = vector.load %arg4[%c0_13, %c0_14] : memref<1x4xf32, #tpu.memory_space<vmem>>, vector<1x4xf32>
      %30 = vector.broadcast %29 : vector<1x4xf32> to vector<2x4xf32>
      %31 = arith.addf %28, %30 : vector<2x4xf32>
      %cst_15 = arith.constant dense<0xFF800000> : vector<2xf32>
      %32 = vector.multi_reduction <maximumf>, %31, %cst_15 [1] : vector<2x4xf32> to vector<2xf32>
      %33 = vector.shape_cast %32 : vector<2xf32> to vector<2x1xf32>
      %34 = vector.broadcast %33 : vector<2x1xf32> to vector<2x4xf32>
      %35 = arith.subf %31, %34 : vector<2x4xf32>
      %36 = math.exp %35 : vector<2x4xf32>
      %cst_16 = arith.constant dense<0.000000e+00> : vector<2xf32>
      %37 = vector.multi_reduction <add>, %36, %cst_16 [1] : vector<2x4xf32> to vector<2xf32>
      %38 = vector.shape_cast %37 : vector<2xf32> to vector<2x1xf32>
      %39 = vector.broadcast %38 : vector<2x1xf32> to vector<2x4xf32>
      %40 = arith.divf %36, %39 : vector<2x4xf32>
      %c0_17 = arith.constant 0 : index
      %c0_18 = arith.constant 0 : index
      %41 = vector.load %arg5[%c0_17, %c0_18] : memref<2x4xf32, #tpu.memory_space<vmem>>, vector<2x4xf32>
      tpu.vector_store %arg5[%c0_17, %c0_18], %40 {strides = array<i32>} : memref<2x4xf32, #tpu.memory_space<vmem>>, vector<2x4xf32>,
    } else {
    }
    return
  }
  func.func @transform_0(%arg0: i32, %arg1: i32) -> (i32, i32) {
    %c0_i32 = arith.constant 0 : i32
    return %arg0, %arg1 : i32, i32
  }
  func.func @transform_1(%arg0: i32, %arg1: i32) -> (i32, i32) {
    %c0_i32 = arith.constant 0 : i32
    %c0_i32_0 = arith.constant 0 : i32
    %c0_i32_1 = arith.constant 0 : i32
    return %c0_i32, %c0_i32_0 : i32, i32
  }
  func.func @transform_2(%arg0: i32, %arg1: i32) -> (i32, i32) {
    %c0_i32 = arith.constant 0 : i32
    %c0_i32_0 = arith.constant 0 : i32
    %c0_i32_1 = arith.constant 0 : i32
    return %c0_i32, %c0_i32_0 : i32, i32
  }
  func.func @transform_3(%arg0: i32, %arg1: i32) -> (i32, i32) {
    %c0_i32 = arith.constant 0 : i32
    %c0_i32_0 = arith.constant 0 : i32
    return %arg0, %c0_i32 : i32, i32
  }
}

</mosaic_0001>

<bundles_post_ra>
// kernel: tpu_custom_call.1
= control target key start
LH: loop header
LB: loop body
LE: loop exit
PB: predicated region body
PF: predicated region fallthrough
CT: control target
= control target key end

     0   :  { %8 = vsyncpa [#allocation4], 0  ;;  %s889_s0 = inlined_call_operand.hbm [shape: f32[8,256], index: 0, kind: input, shape index: {}]   ;;  %s890_s1 = inlined_call_operand.hbm [shape: f32[4,4], index: 1, kind: input, shape index: {}]   ;;  %s891_s2 = inlined_call_operand.vmem [shape: f32[1,4], index: 2, kind: input, shape index: {}]   ;;  %s892_s3 = inlined_call_operand.hbm [shape: f32[2,4], index: 3, kind: output, shape index: {}]  }
   0x1   :  { %10 = vsyncpa [#allocation4 + $0x1], 0 }
   0x2   :  { %11 = vsyncpa [#allocation7], 0 }
   0x3   :  { %12 = vsyncpa [#allocation5], 0  ;;  %s693_s12 = smov 0   ;;  %s695_s13 = smov 0  }
   0x4   :  { %s697_s14 = smov 0   ;;  %s699_s15 = smov 0  }
   0x5   :  { %s701_s16 = smov 0   ;;  %s703_s17 = smov 0  }
   0x6 LB: > { %s418_s18 = sadd.s32 4294967295, %s665_s17   ;;  %p52_p0 = scmp.ne.s32.totalorder %s649_s13, %s645_s12  ;;  %s665_s17 = sphi %s703_s17, %s18_s17   ;;  %s661_s16 = sphi %s701_s16, %s912_s16   ;;  %s657_s15 = sphi %s699_s15, %s911_s15   ;;  %s653_s14 = sphi %s697_s14, %s910_s14   ;;  %s649_s13 = sphi %s695_s13, %s909_s13   ;;  %s645_s12 = sphi %s693_s12, %s908_s12  }
   0x7   : > { %p725_p1 = scmp.eq.s32.totalorder %s418_s18, 0  ;;  %p419_p2 = scmp.ge.s32.totalorder %s665_s17, 1 }
   0x8   : > { %p131_p3 = scmp.lt.s32.totalorder %s665_s17, 3  ;;  %s667_s22 = smov [#allocation6]  }
   0x9   : > { %s897_s19 = scalar_select %p725_p1, 1, 0 }
   0xa   : > { %p733_p4 = por %p725_p1, %p52_p0  ;;  %p737_p5 = pnand %p419_p2, %p131_p3 }
   0xb   : > { %s144_s23 = sshll.u32 %s667_s22, 4  ;;  %s27_s25 = sadd.s32 1, %s661_s16  ;;  %s145_s23 = int_to_ptr.vmem [resolvable:$true] %s144_s23 }
   0xc   : > { %s898_s20 = scalar_select %p733_p4, 1, 0 }
   0xd   : > { %s899_s21 = scalar_select %p737_p5, 1, 0 }
   0xe   : > { %p453_p6 = pneg %p737_p5  ;;  %s39_s26 = sadd.s32 1, %s653_s14 }
   0xf   : > { %p751_p8 = scmp.ge.s32.totalorder %s27_s25, 2  ;;  %s523_s30 = scalar_lea.hbm %s890_s1, 64 }
  0x10   : > { %p745_p7 = pnand %p453_p6, %p725_p1  ;;  %p524_p9 = scmp.ne.s32.totalorder %s890_s1, %s523_s30 }
  0x11   : > { %s901_s27 = scalar_select %p751_p8, 1, 0 }
  0x12   : > { %p525_p10 = pneg %p745_p7  ;;  %p530_p13 = scmp.lt.u32.totalorder %s523_s30, %s890_s1 }
  0x14   : > { %p526_p11 = pnand %p525_p10, %p524_p9 }
  0x16   : > { %p527_p12 = pneg %p526_p11 }
  0x18   : > { %p532_p0 = pnand %p530_p13, %p527_p12 }
  0x1a   : > { %535 = shalt.err (!%p532_p0)
}
  0x1b   : > { %s536_s8 = scalar_lea.vmem %s145_s23, 64  ;;  %p544_p1 = scmp.lt.s32.totalorder %s145_s23, %s145_s23 }
  0x1c   : > { %p537_p2 = scmp.ne.s32.totalorder %s145_s23, %s536_s8  ;;  %p545_p4 = scmp.lt.s32.totalorder %s536_s8, %s536_s8 }
  0x1e   : > { %p539_p3 = pnand %p537_p2, %p525_p10  ;;  %p546_p5 = por %p545_p4, %p544_p1 }
  0x20   : > { %p540_p6 = pneg %p539_p3 }
  0x22   : > { %p547_p8 = pnand %p546_p5, %p540_p6 }
  0x24   : > { %550 = shalt.err (!%p547_p8)
}
  0x25   : > { %456 = dma.hbm_to_vmem [thread:$0]  (!%p745_p7), %s890_s1, 64, %s145_s23, [#allocation7]  }
  0x26   : > { %p902_p9 = scmp.ne.s32.totalorder %s901_s27, 0  ;;  %p46_p1 = scmp.ne.s32.totalorder %s653_s14, %s649_s13 }
  0x27   : > { %p47_p4 = scmp.eq.s32.totalorder %s665_s17, 0  ;;  %p462_p5 = scmp.lt.s32.totalorder %s665_s17, 2 }
  0x28   : > { %s914_s25 = smov (%p902_p9, %s27_s25), 0  ;;  %s158_s12 = sand.u32 1, %s653_s14  }
  0x29   : > { %s35_s11 = ssub.s32 %s661_s16, %s914_s25  ;;  %p48_p10 = por %p47_p4, %p46_p1 }
  0x2a   : > { %p37_p8 = scmp.eq.s32.totalorder %s35_s11, 0  ;;  %s423_s22 = sshll.u32 %s661_s16, 7 }
  0x2b   : > { %s422_s28 = sshll.u32 %s158_s12, 3  ;;  %s791_s23 = scalar_lea.hbm %s889_s0, %s423_s22 }
  0x2c   : > { %s786_s24 = scalar_select %p37_p8, %s653_s14, %s39_s26  }
  0x2d   : > { %s162_s27 = scalar_lea.vmem [#allocation3], %s422_s28  ;;  %p793_p7 = pnand %p462_p5, %p48_p10 }
  0x2e   : > { %s171_s4 = sshll.u32 %s162_s27, 4  ;;  %s159_s26 = scalar_lea.sflag [#allocation4], %s158_s12  ;;  %s797_s4 = int_to_ptr.vmem [resolvable:$true] %s171_s4 }
  0x2f   : > { %s551_s6 = scalar_lea.hbm %s791_s23, 128  ;;  %p553_p12 = pneg %p793_p7 }
  0x30   : > { %p552_p11 = scmp.ne.s32.totalorder %s791_s23, %s551_s6  ;;  %s556_s9 = scalar_lea.hbm %s889_s0, 256 }
  0x31   : > { %p557_p2 = scmp.lt.u32.totalorder %s791_s23, %s889_s0  ;;  %p558_p3 = scmp.lt.u32.totalorder %s556_s9, %s551_s6 }
  0x32   : > { %p554_p13 = pnand %p553_p12, %p552_p11  ;;  %p560_p9 = scmp.lt.u32.totalorder %s551_s6, %s791_s23 }
  0x33   : > { %p559_p6 = por %p558_p3, %p557_p2 }
  0x34   : > { %p555_p0 = pneg %p554_p13 }
  0x35   : > { %p561_p1 = por %p560_p9, %p559_p6 }
  0x37   : > { %p562_p4 = pnand %p561_p1, %p555_p0 }
  0x39   : > { %565 = shalt.err (!%p562_p4)
}
  0x3a   : > { %s566_s12 = scalar_lea.vmem %s797_s4, 128  ;;  %s668_s22 = smov [#allocation3]  }
  0x3b   : > { %p567_p5 = scmp.ne.s32.totalorder %s797_s4, %s566_s12  ;;  %s571_s28 = sshll.u32 %s668_s22, 4  ;;  %s572_s28 = int_to_ptr.vmem [resolvable:$false] %s571_s28 }
  0x3c   : > { %s573_s29 = scalar_lea.vmem %s572_s28, 256  ;;  %p574_p11 = scmp.lt.s32.totalorder %s797_s4, %s572_s28 }
  0x3d   : > { %p569_p8 = pnand %p567_p5, %p553_p12  ;;  %p575_p13 = scmp.lt.s32.totalorder %s573_s29, %s566_s12 }
  0x3f   : > { %p570_p10 = pneg %p569_p8  ;;  %p576_p2 = por %p575_p13, %p574_p11 }
  0x41   : > { %p577_p3 = pnand %p576_p2, %p570_p10 }
  0x43   : > { %580 = shalt.err (!%p577_p3)
}
  0x44   : > { %460 = dma.hbm_to_vmem [thread:$0]  (!%p793_p7), %s791_s23, 128, %s797_s4, %s159_s26  }
  0x45   : > { %p904_p0 = scmp.ne.s32.totalorder %s899_s21, 0 }
  0x46   : > { %s182_s30 = sand.u32 (!%p904_p0), 1, %s649_s13   ;;  %p905_p12 = scmp.ne.s32.totalorder (!%p904_p0), %s898_s20, 0 }
  0x47   : > { %180 = sbr.rel (%p904_p0) target bundleno = 801 (0x321), region = 32  ;;  %s425_s27 = sshll.u32 (!%p904_p0), %s182_s30, 3 }
  0x48   : > { %s183_s6 = scalar_lea.sflag (!%p904_p0), [#allocation4], %s182_s30  ;;  %s186_s7 = scalar_lea.vmem (!%p904_p0), [#allocation3], %s425_s27 }
  0x4e   : > { %632 = dma.done.wait (%p905_p12), %s183_s6, 128  }
  0x4f   : > { %634 = vsyncadd (%p905_p12), %s183_s6, 4294967168  ;;  %p906_p6 = scmp.ne.s32.totalorder %s897_s19, 0 }
  0x51   : > { %636 = dma.done.wait (%p906_p6), [#allocation7], 64  }
  0x52   : > { %638 = vsyncadd (%p906_p6), [#allocation7], 4294967232  ;;  %p427_p7 = scmp.ne.s32.totalorder %s657_s15, 0 }
  0x53   : > { %v669_v0 = vmov (!%p427_p7), 0.0  }
  0x54   : > { %211 = sbr.rel (%p427_p7) target bundleno = 91 (0x5b), region = 44  ;;  %212 = vst [vmem:[#allocation2] sm:$0xff] (!%p427_p7), %v669_v0 }
  0x5b PF: > { %v213_v1 = vld [vmem:[#allocation2] sm:$0xff]  ;;  %v214_v2 = vld [vmem:[%s186_s7] sm:$0xff]  ;;  %p428_p9 = scmp.ne.s32.totalorder %s657_s15, 1 }
  0x5c   : > { %v215_v3 = vadd.f32 %v214_v2, %v213_v1  ;;  %v670_v5 = vmov (!%p428_p9), 0.0   ;;  %vm671_vm0 = vmmov (!%p428_p9), 0   ;;  %v231_v6 = vlaneseq (!%p428_p9)  ;;  %v224_v9 = vld [vmem:[#allocation6] sm:$0xf] (!%p428_p9)  ;;  %v430_v17 = vld [vmem:[%s891_s2] ss:$0 sm:$0xff] (!%p428_p9) }
  0x5d   : > { %220 = sbr.rel (%p428_p9) target bundleno = 776 (0x308), region = 48  ;;  %438 = vmatprep.subr.mxu0 (!%p428_p9), %v670_v5  ;;  %440 = vmatprep.mubr.msk.f32.mxu0 (!%p428_p9), %vm671_vm0, %v670_v5  ;;  %v226_v12 = vrot.slane (!%p428_p9), %v224_v9, 4  ;;  %vm228_vm1 = vcmask (!%p428_p9), 1043456   ;;  %vm249_vm5 = vcmask (!%p428_p9), 64512   ;;  %vm323_vm6 = vcmask (!%p428_p9), 25600  }
  0x5e   : > { %216 = vst [vmem:[#allocation2] sm:$0xff] %v215_v3  ;;  %v234_v7 = vshrl.u32 (!%p428_p9), %v231_v6, 7  ;;  %v232_v10 = vand.u32 (!%p428_p9), 127, %v231_v6 }
  0x5f   : > { %v229_v13 = vsel (!%p428_p9), %vm228_vm1, %v224_v9, %v226_v12 }
  0x60   : > { %v235_v8 = vmul.u32 (!%p428_p9), 4, %v234_v7 }
  0x62   : > { %v237_v11 = vadd.s32 (!%p428_p9), 4, %v235_v8  ;;  %vm236_vm2 = vcmp.ge.s32.totalorder (!%p428_p9), %v232_v10, %v235_v8 }
  0x64   : > { %vm238_vm3 = vcmp.lt.s32.totalorder %v232_v10, %v237_v11 }
  0x65   : > { %v221_v4 = vld [vmem:[#allocation2] sm:$0xff]  ;;  %vm239_vm4 = vmand %vm236_vm2, %vm238_vm3 }
  0x66   : > { %222 = vadd.xlane.f32.xlu0 %v221_v4  ;;  %v429_v16 = vsel %vm239_vm4, 1.0, %v670_v5 }
  0xf3   : > { %v223_v14 = vpop.xlane.xlu0 %222 }
  0xf4   : > { %v230_v15 = vmul.f32 %v229_v13, %v223_v14 }
  0xf6   : > { %439 = vmatpush3.msra.mxu0 %v230_v15 }
  0xf7   : > { %441 = vmatmul.mubr.msk.f32.vlgmr.msra.gmra.mrb[0].mxu0 %vm249_vm5, %v429_v16 }
 0x1ca   : > { %v319_v18 = vpop.f32.mrb[0].mxu0 }
 0x1cb   : > { %v320_v19 = vadd.f32 %v430_v17, %v319_v18  ;;  %v442_v20 = vpop.f32.mrb[1].mxu0 }
 0x1cd   : > { %v324_v21 = vsel %vm323_vm6, %v320_v19, -inf }
 0x1ce   : > { %325 = vmax.xlane.f32.xlu0 %v324_v21 }
 0x25b   : > { %v326_v22 = vpop.xlane.xlu0 %325 }
 0x25c   : > { %v327_v23 = vsub.f32 %v320_v19, %v326_v22 }
 0x25e   : > { %v328_v24 = vmul.f32 1.442695, %v327_v23 }
 0x260   : > { %519 = vpow2.f32 %v328_v24 }
 0x26a   : > { %v520_v25 = vpop.eup %519 }
 0x26b   : > { %v330_v26 = vsel %vm323_vm6, %v520_v25, 0.0 }
 0x26c   : > { %331 = vadd.xlane.f32.xlu1 %v330_v26 }
 0x2f9   : > { %v332_v27 = vpop.xlane.xlu1 %331 }
 0x2fa   : > { %521 = vrcp.f32 %v332_v27 }
 0x304   : > { %v522_v28 = vpop.eup %521 }
 0x305   : > { %v334_v29 = vmul.f32 %v522_v28, %v520_v25 }
 0x307   : > { %335 = vst.msk [vmem:[#allocation8] sm:$0x3] %vm323_vm6, %v334_v29 }
 0x308 PF: > { %p845_p1 = scmp.eq.s32.totalorder %s418_s18, 1  ;;  %s672_s21 = smov [#allocation8]  }
 0x309   : > { %s345_s23 = sshll.u32 %s672_s21, 4  ;;  %s346_s23 = int_to_ptr.vmem [resolvable:$true] %s345_s23 }
 0x30a   : > { %s581_s4 = scalar_lea.vmem %s346_s23, 32  ;;  %p588_p10 = scmp.lt.s32.totalorder %s346_s23, %s346_s23 }
 0x30b   : > { %p582_p4 = scmp.ne.s32.totalorder %s346_s23, %s581_s4  ;;  %p589_p11 = scmp.lt.s32.totalorder %s581_s4, %s581_s4 }
 0x30d   : > { %p583_p5 = pnand %p582_p4, %p845_p1  ;;  %p590_p13 = por %p589_p11, %p588_p10 }
 0x30f   : > { %p584_p8 = pneg %p583_p5 }
 0x311   : > { %p591_p2 = pnand %p590_p13, %p584_p8 }
 0x313   : > { %594 = shalt.err (!%p591_p2)
}
 0x314   : > { %s595_s18 = scalar_lea.hbm %s892_s3, 32 }
 0x315   : > { %p596_p3 = scmp.ne.s32.totalorder %s892_s3, %s595_s18  ;;  %p601_p6 = scmp.lt.u32.totalorder %s595_s18, %s892_s3 }
 0x317   : > { %p597_p0 = pnand %p596_p3, %p845_p1 }
 0x319   : > { %p598_p12 = pneg %p597_p0 }
 0x31b   : > { %p603_p7 = pnand %p601_p6, %p598_p12 }
 0x31d   : > { %606 = shalt.err (!%p603_p7)
}
 0x31e   : > { %450 = dma.vmem_to_hbm [thread:$0]  (%p845_p1), %s346_s23, 32, %s892_s3, [#allocation5]  }
 0x31f   : > { %640 = dma.done.wait (%p845_p1), [#allocation5], 32  }
 0x320   : > { %642 = vsyncadd (%p845_p1), [#allocation5], 4294967264 }
 0x321 PF: > { %s18_s17 = sadd.s32 1, %s665_s17   ;;  %s908_s12 = smov %s649_s13 }
 0x322   : > { %p15_p9 = scmp.ge.s32.totalorder %s18_s17, 4   ;;  %s909_s13 = smov %s653_s14 }
 0x323   : > { %s910_s14 = smov %s786_s24  ;;  %s911_s15 = smov %s661_s16 }
 0x324   : > { %s912_s16 = smov %s914_s25  ;;  %17 = sbr.rel (!%p15_p9) target bundleno = 6 (0x6), region = 82 }
 0x32b   :  { %358 = vsyncpa [#allocation4], 1 }
 0x32c   :  { %360 = vsyncpa [#allocation4 + $0x1], 1 }
 0x32d   :  { %361 = vsyncpa [#allocation7], 1 }
 0x32e   :  { %362 = vsyncpa [#allocation5], 1 }
 0x32f   :  { %364 = vsyncpa [#allocation5 + $0x1], 1 }

</bundles_post_ra>
